<compile_context>
chip_gen: v7x
topology: tpu7x:2x2x1
jax: 0.10.0
libtpu: 0.0.40
codegen_flags: <defaults>
</compile_context>

<pallas_src>
import functools
import math

import jax
import jax.numpy as jnp
from jax.experimental import pallas as pl
from jax.experimental.pallas import tpu as pltpu


_HEAD_LANES = 128   # actor logits | value | entropy packed into one 128-lane tile


def _lstm_policy_kernel(n_acts, x_ref, we_ref, wg_ref, wh_ref, b_ref, hc0_ref,
                        out_ref, hc_sc):
    """One (batch-tile, timestep) grid point of the fused LSTMPolicy forward.

    x_ref   : [TB, obs]        observation tile (time dim squeezed)
    we_ref  : [obs, H]   bf16  encoder weight
    wg_ref  : [2H, 4H]   bf16  fused LSTM gate weight [w_ih ; w_hh]
    wh_ref  : [H, 128]   bf16  actor|value head, zero-padded to 128 lanes
    b_ref   : [1, 5H+128] f32  enc bias | gate bias | head bias (padded)
    hc0_ref : [TB, 2H]   f32   initial (h | c) for this batch tile
    out_ref : [TB, 128+2H] f32 (logp | value | entropy | pad) | h | c
    hc_sc   : [TB, 2H]   f32   recurrent state carried across timesteps (VMEM)
    """
    H = hc0_ref.shape[1] // 2
    A = n_acts
    t = pl.program_id(1)

    @pl.when(t == 0)
    def _():
        hc_sc[...] = hc0_ref[...]

    b_enc = b_ref[:, 0:H]
    b_gates = b_ref[:, H:5 * H]
    b_heads = b_ref[:, 5 * H:5 * H + _HEAD_LANES]

    # ---- encoder: Linear + ReLU (bf16 MXU operands, f32 accumulate) ----
    x = x_ref[...].astype(jnp.bfloat16)
    enc = jnp.dot(x, we_ref[...], preferred_element_type=jnp.float32) + b_enc
    enc = jnp.maximum(enc, 0.0)

    # ---- LSTMCell, single K=2H MXU pass: [enc | h] @ [w_ih ; w_hh] ----
    h0 = hc_sc[:, 0:H]
    c0 = hc_sc[:, H:2 * H]
    eh = jnp.concatenate([enc.astype(jnp.bfloat16), h0.astype(jnp.bfloat16)],
                         axis=-1)
    gates = jnp.dot(eh, wg_ref[...], preferred_element_type=jnp.float32) + b_gates

    def sig(v):   # sigmoid via one tanh EUP push (instead of exp + reciprocal)
        return 0.5 * (jnp.tanh(0.5 * v) + 1.0)

    # PyTorch gate order i, f, g, o; with H=128 each slice is one vreg tile.
    i_g = sig(gates[:, 0 * H:1 * H])
    f_g = sig(gates[:, 1 * H:2 * H])
    g_g = jnp.tanh(gates[:, 2 * H:3 * H])
    o_g = sig(gates[:, 3 * H:4 * H])
    c_new = f_g * c0 + i_g * g_g
    h_new = o_g * jnp.tanh(c_new)

    # ---- fused actor + value head: one [H, 128] matmul -> full-lane tile ----
    heads = (jnp.dot(h_new.astype(jnp.bfloat16), wh_ref[...],
                     preferred_element_type=jnp.float32) + b_heads)

    # ---- log-softmax / entropy over the first A lanes only ----
    lane = jax.lax.broadcasted_iota(jnp.int32, heads.shape, 1)
    is_act = lane < A
    logits = jnp.where(is_act, heads, jnp.float32(-1e30))
    m = jnp.max(logits, axis=-1, keepdims=True)
    p = jnp.exp(logits - m)                      # exactly 0 on masked lanes
    s = jnp.sum(p, axis=-1, keepdims=True)
    logp = logits - (m + jnp.log(s))
    probs = p * pl.reciprocal(s, approx=True)
    ent = -jnp.sum(jnp.where(is_act, logp * probs, 0.0), axis=-1, keepdims=True)

    # assemble lanes in-register: [0:A) logp | [A] value | [A+1] entropy | 0 pad
    packed = jnp.where(is_act, logp, 0.0)
    packed = jnp.where(lane == A, heads, packed)   # value column passes through
    packed = jnp.where(lane == A + 1, ent, packed)

    # three unmasked, 128-lane-aligned stores (no zero fill, no vst.msk)
    out_ref[:, 0:_HEAD_LANES] = packed
    out_ref[:, _HEAD_LANES:_HEAD_LANES + H] = h_new
    out_ref[:, _HEAD_LANES + H:_HEAD_LANES + 2 * H] = c_new

    # carry recurrent state to the next timestep in VMEM
    hc_sc[:, 0:H] = h_new
    hc_sc[:, H:2 * H] = c_new


@functools.partial(jax.jit, static_argnames=("n_acts",))
def _lstm_policy_core(x, w_enc, w_gates, w_heads, b_all, hc0, *, n_acts):
    """x: [T, Bp, obs] -> slab [T, Bp, 128 + 2H]."""
    T, Bp, obs_dim = x.shape
    H = hc0.shape[1] // 2
    out_lanes = _HEAD_LANES + 2 * H

    TB = Bp if Bp <= 256 else 256     # batch tile (Bp is padded to a multiple)
    nb = Bp // TB

    flops = 2 * T * Bp * (obs_dim * H + (2 * H) * (4 * H) + H * _HEAD_LANES)
    transcendentals = T * Bp * (5 * H + _HEAD_LANES + 2)
    bytes_accessed = (x.size * x.dtype.itemsize
                      + w_enc.size * 2 + w_gates.size * 2 + w_heads.size * 2
                      + b_all.size * 4 + hc0.size * 4
                      + T * Bp * out_lanes * 4)

    kernel = functools.partial(_lstm_policy_kernel, n_acts)

    return pl.pallas_call(
        kernel,
        out_shape=jax.ShapeDtypeStruct((T, Bp, out_lanes), jnp.float32),
        grid_spec=pltpu.PrefetchScalarGridSpec(
            num_scalar_prefetch=0,
            grid=(nb, T),
            in_specs=[
                pl.BlockSpec((None, TB, obs_dim), lambda b, t: (t, b, 0)),
                # weights/biases: constant index_map -> DMA'd once, VMEM-resident
                pl.BlockSpec((obs_dim, H), lambda b, t: (0, 0)),
                pl.BlockSpec((2 * H, 4 * H), lambda b, t: (0, 0)),
                pl.BlockSpec((H, _HEAD_LANES), lambda b, t: (0, 0)),
                pl.BlockSpec((1, 5 * H + _HEAD_LANES), lambda b, t: (0, 0)),
                pl.BlockSpec((TB, 2 * H), lambda b, t: (b, 0)),
            ],
            out_specs=pl.BlockSpec((None, TB, out_lanes), lambda b, t: (t, b, 0)),
            scratch_shapes=[pltpu.VMEM((TB, 2 * H), jnp.float32)],
        ),
        compiler_params=pltpu.CompilerParams(
            dimension_semantics=("parallel", "arbitrary")),
        cost_estimate=pl.CostEstimate(flops=flops,
                                      transcendentals=transcendentals,
                                      bytes_accessed=bytes_accessed),
    )(x, w_enc, w_gates, w_heads, b_all, hc0)


# ---------------------------------------------------------------------------
# wrappers
# ---------------------------------------------------------------------------

def _round_up(n, m):
    return -(-n // m) * m


def _pad_batch(b):
    bp = _round_up(max(b, 16), 16)      # bf16 MXU operands pack [16, 128]
    if bp > 256:
        bp = _round_up(bp, 256)         # grid over batch uses 256-row tiles
    return bp


def _prep_obs(x_flat, Bp):
    if x_flat.dtype != jnp.bfloat16:
        x_flat = x_flat.astype(jnp.float32)
    B = x_flat.shape[-2]
    if Bp != B:
        pad = [(0, 0)] * (x_flat.ndim - 2) + [(0, Bp - B), (0, 0)]
        x_flat = jnp.pad(x_flat, pad)
    return x_flat


def _prep_state(state, Bp, H):
    if state is None:
        return jnp.zeros((Bp, 2 * H), jnp.float32)
    h0, c0 = state
    hc0 = jnp.concatenate([jnp.asarray(h0), jnp.asarray(c0)],
                          axis=-1).astype(jnp.float32)
    if hc0.shape[0] != Bp:
        hc0 = jnp.pad(hc0, ((0, Bp - hc0.shape[0]), (0, 0)))
    return hc0


def lstm_policy_forward(params, x, state=None, act=None, with_entropy=None,
                        rng=None):
    """Mirrors LSTMPolicy.forward (single step, T=1 case of the fused kernel).

    x: [B, C, H, W]. Returns (act, logprob, entropy, value, (h, c))."""
    with_entropy = (act is not None) if with_entropy is None else with_entropy
    B = x.shape[0]
    H = params["w_gates"].shape[0] // 2
    A = params["n_acts"]
    Bp = _pad_batch(B)

    x_flat = _prep_obs(x.reshape(B, -1), Bp)[None]          # [1, Bp, obs]
    hc0 = _prep_state(state, Bp, H)

    slab = _lstm_policy_core(x_flat, params["w_enc"], params["w_gates"],
                             params["w_heads"], params["b_all"], hc0,
                             n_acts=A)[0]

    logp = slab[:B, 0:A]
    value = slab[:B, A]
    ent = slab[:B, A + 1]
    h = slab[:B, _HEAD_LANES:_HEAD_LANES + H]
    c = slab[:B, _HEAD_LANES + H:_HEAD_LANES + 2 * H]

    if act is None:
        if rng is None:
            rng = jax.random.PRNGKey(0)
        # torch.multinomial(softmax(logits), 1) == categorical sampling
        act = jax.random.categorical(rng, logp, axis=-1).astype(jnp.uint8)
        act = jnp.squeeze(act)
    act_idx = jnp.atleast_1d(act).astype(jnp.int32)
    logprob = jnp.take_along_axis(logp, act_idx[:, None], axis=-1)[:, 0]
    entropy = ent if with_entropy else None
    return act, logprob, entropy, value, (h, c)


def lstm_policy_rollout(params, xs, acts, state=None):
    """T-step training-time forward fused into ONE pallas_call: weights are
    DMA'd once and stay VMEM-resident for the whole trajectory; h/c are carried
    step-to-step in VMEM scratch.

    xs: [T, B, ...obs], acts: [T, B] int.
    Returns (logprob [T,B], entropy [T,B], value [T,B], (h, c) final state)."""
    T, B = xs.shape[:2]
    H = params["w_gates"].shape[0] // 2
    A = params["n_acts"]
    Bp = _pad_batch(B)

    xs_flat = _prep_obs(xs.reshape(T, B, -1), Bp)
    hc0 = _prep_state(state, Bp, H)

    slab = _lstm_policy_core(xs_flat, params["w_enc"], params["w_gates"],
                             params["w_heads"], params["b_all"], hc0, n_acts=A)

    logp = slab[:, :B, 0:A]
    value = slab[:, :B, A]
    ent = slab[:, :B, A + 1]
    h = slab[T - 1, :B, _HEAD_LANES:_HEAD_LANES + H]
    c = slab[T - 1, :B, _HEAD_LANES + H:_HEAD_LANES + 2 * H]

    act_idx = jnp.asarray(acts).astype(jnp.int32)
    logprob = jnp.take_along_axis(logp, act_idx[..., None], axis=-1)[..., 0]
    return logprob, ent, value, (h, c)


# ---------------------------------------------------------------------------
# parameter init (PyTorch-equivalent, pre-packed for the fused kernel)
# ---------------------------------------------------------------------------

def _orthogonal(key, shape):
    rows, cols = shape
    n = max(rows, cols)
    a = jax.random.normal(key, (n, n), dtype=jnp.float32)
    q, r = jnp.linalg.qr(a)
    sign = jnp.sign(jnp.diag(r))
    sign = jnp.where(sign == 0, 1.0, sign)
    q = q * sign[None, :]
    return q[:rows, :cols]


def init_params(key, obs_dim, hidden, n_acts):
    assert hidden % 128 == 0, "kernel assumes lane-aligned hidden (default 128)"
    assert n_acts + 2 <= _HEAD_LANES, "logits|value|entropy must fit 128 lanes"
    ks = jax.random.split(key, 8)
    s_enc = 1.0 / math.sqrt(obs_dim)
    s_h = 1.0 / math.sqrt(hidden)

    # encoder / actor / value: PyTorch-default uniform-style init
    w_enc = jax.random.uniform(ks[0], (obs_dim, hidden), jnp.float32, -s_enc, s_enc)
    b_enc = jax.random.uniform(ks[1], (hidden,), jnp.float32, -s_enc, s_enc)
    w_actor = jax.random.uniform(ks[2], (hidden, n_acts), jnp.float32, -s_h, s_h)
    b_actor = jax.random.uniform(ks[3], (n_acts,), jnp.float32, -s_h, s_h)
    w_value = jax.random.uniform(ks[4], (hidden, 1), jnp.float32, -s_h, s_h)
    b_value = jax.random.uniform(ks[5], (1,), jnp.float32, -s_h, s_h)

    # LSTMCell: cleanrl_init -> orthogonal weights, zero biases; gate order i,f,g,o.
    # Stored transposed ([in, 4*hidden]) for x @ W layout.
    w_ih = _orthogonal(ks[6], (4 * hidden, hidden)).T     # [H, 4H]
    w_hh = _orthogonal(ks[7], (4 * hidden, hidden)).T     # [H, 4H]
    b_ih = jnp.zeros((4 * hidden,), jnp.float32)
    b_hh = jnp.zeros((4 * hidden,), jnp.float32)

    # ---- pre-pack for the fused kernel (done once, outside the hot path) ----
    w_gates = jnp.concatenate([w_ih, w_hh], axis=0)        # [2H, 4H]
    b_gates = b_ih + b_hh                                  # [4H]

    # actor | value head, zero-padded to a full 128-lane tile
    w_heads = jnp.zeros((hidden, _HEAD_LANES), jnp.float32)
    w_heads = w_heads.at[:, :n_acts].set(w_actor)
    w_heads = w_heads.at[:, n_acts].set(w_value[:, 0])
    b_heads = jnp.zeros((_HEAD_LANES,), jnp.float32)
    b_heads = b_heads.at[:n_acts].set(b_actor)
    b_heads = b_heads.at[n_acts].set(b_value[0])

    b_all = jnp.zeros((1, 5 * hidden + _HEAD_LANES), jnp.float32)
    b_all = b_all.at[0, 0:hidden].set(b_enc)
    b_all = b_all.at[0, hidden:5 * hidden].set(b_gates)
    b_all = b_all.at[0, 5 * hidden:].set(b_heads)

    return {
        "n_acts": int(n_acts),
        "w_enc": w_enc.astype(jnp.bfloat16),       # bf16 MXU operands
        "w_gates": w_gates.astype(jnp.bfloat16),
        "w_heads": w_heads.astype(jnp.bfloat16),
        "b_all": b_all,                            # biases stay f32
    }


if __name__ == "__main__":
    B, C, Hs, Ws = 2, 4, 16, 16
    hidden = 128          # LSTMPolicy default hidden_size
    n_acts = 8
    obs_dim = C * Hs * Ws

    key = jax.random.PRNGKey(0)
    k_param, k_x, k_act, k_xs, k_as = jax.random.split(key, 5)
    params = init_params(k_param, obs_dim, hidden, n_acts)
    x = jax.random.normal(k_x, (B, C, Hs, Ws), dtype=jnp.float32)

    # Path 1: sample actions (state=None, entropy not returned)
    act, logprob, entropy, value, (h, c) = lstm_policy_forward(
        params, x, state=None, act=None, rng=k_act)
    jax.block_until_ready((act, logprob, value, h, c))
    assert act.shape == (B,) and logprob.shape == (B,) and value.shape == (B,)
    assert entropy is None
    assert h.shape == (B, hidden) and c.shape == (B, hidden)
    assert bool(jnp.all(jnp.isfinite(logprob))) and bool(jnp.all(jnp.isfinite(value)))

    # Path 2: given actions (entropy returned), carrying the recurrent state
    given_act = jnp.array([1, 3], dtype=jnp.int32)
    act2, logprob2, entropy2, value2, (h2, c2) = lstm_policy_forward(
        params, x, state=(h, c), act=given_act)
    jax.block_until_ready((act2, logprob2, entropy2, value2, h2, c2))
    assert entropy2.shape == (B,) and bool(jnp.all(jnp.isfinite(entropy2)))

    # Path 3: fused multi-step rollout (weights stay VMEM-resident over T steps)
    T = 4
    xs = jax.random.normal(k_xs, (T, B, C, Hs, Ws), dtype=jnp.float32)
    acts = jax.random.randint(k_as, (T, B), 0, n_acts)
    lp_r, ent_r, val_r, (h_r, c_r) = lstm_policy_rollout(params, xs, acts, state=None)
    jax.block_until_ready((lp_r, ent_r, val_r, h_r, c_r))
    assert lp_r.shape == (T, B) and ent_r.shape == (T, B) and val_r.shape == (T, B)

    # cross-check the fused rollout against T single-step kernel calls
    st = None
    for t in range(T):
        _, lp_t, ent_t, val_t, st = lstm_policy_forward(
            params, xs[t], state=st, act=acts[t])
        assert bool(jnp.allclose(lp_t, lp_r[t], atol=1e-5, rtol=1e-5))
        assert bool(jnp.allclose(ent_t, ent_r[t], atol=1e-5, rtol=1e-5))
        assert bool(jnp.allclose(val_t, val_r[t], atol=1e-5, rtol=1e-5))
    h_s, c_s = st
    assert bool(jnp.allclose(h_s, h_r, atol=1e-5, rtol=1e-5))
    assert bool(jnp.allclose(c_s, c_r, atol=1e-5, rtol=1e-5))

    print("KERNEL_OK")
</pallas_src>

<mosaic_0001>
module attributes {stable_mosaic.version = 11 : i64} {
  func.func @_lstm_policy_kernel(%arg0: i32, %arg1: i32, %arg2: memref<1x16x1024xf32, #tpu.memory_space<vmem>>, %arg3: memref<1024x128xbf16, #tpu.memory_space<vmem>>, %arg4: memref<256x512xbf16, #tpu.memory_space<vmem>>, %arg5: memref<128x128xbf16, #tpu.memory_space<vmem>>, %arg6: memref<1x768xf32, #tpu.memory_space<vmem>>, %arg7: memref<16x256xf32, #tpu.memory_space<vmem>>, %arg8: memref<1x16x384xf32, #tpu.memory_space<vmem>>, %arg9: memref<16x256xf32, #tpu.memory_space<vmem>>) attributes {dimension_semantics = [#tpu.dimension_semantics<parallel>, #tpu.dimension_semantics<arbitrary>], iteration_bounds = array<i64: 1, 1>, scalar_prefetch = 0 : i64, scratch_operands = 1 : i64, tpu.core_type = #tpu.core_type<tc>, window_params = [{transform_indices = @transform_0, window_bounds = array<i64: 1, 16, 1024>}, {pipeline_mode = #tpu.pipeline_mode<synchronous>, transform_indices = @transform_1, window_bounds = array<i64: 1024, 128>}, {pipeline_mode = #tpu.pipeline_mode<synchronous>, transform_indices = @transform_2, window_bounds = array<i64: 256, 512>}, {pipeline_mode = #tpu.pipeline_mode<synchronous>, transform_indices = @transform_3, window_bounds = array<i64: 128, 128>}, {pipeline_mode = #tpu.pipeline_mode<synchronous>, transform_indices = @transform_4, window_bounds = array<i64: 1, 768>}, {transform_indices = @transform_5, window_bounds = array<i64: 16, 256>}, {transform_indices = @transform_6, window_bounds = array<i64: 1, 16, 384>}]} {
    %c0_i32 = arith.constant 0 : i32
    %0 = arith.cmpi eq, %arg1, %c0_i32 : i32
    %1 = arith.extui %0 : i1 to i32
    %c0_i32_0 = arith.constant 0 : i32
    %2 = arith.cmpi ne, %1, %c0_i32_0 : i32
    scf.if %2 {
      %c0_49 = arith.constant 0 : index
      %c0_50 = arith.constant 0 : index
      %107 = vector.load %arg7[%c0_49, %c0_50] : memref<16x256xf32, #tpu.memory_space<vmem>>, vector<16x256xf32>
      %c0_51 = arith.constant 0 : index
      %c0_52 = arith.constant 0 : index
      %108 = vector.load %arg9[%c0_51, %c0_52] : memref<16x256xf32, #tpu.memory_space<vmem>>, vector<16x256xf32>
      tpu.vector_store %arg9[%c0_51, %c0_52], %107 {strides = array<i32>} : memref<16x256xf32, #tpu.memory_space<vmem>>, vector<16x256xf32>,
    } else {
    }
    %c0 = arith.constant 0 : index
    %c0_1 = arith.constant 0 : index
    %3 = vector.load %arg6[%c0, %c0_1] : memref<1x768xf32, #tpu.memory_space<vmem>>, vector<1x128xf32>
    %c0_2 = arith.constant 0 : index
    %c128 = arith.constant 128 : index
    %4 = vector.load %arg6[%c0_2, %c128] : memref<1x768xf32, #tpu.memory_space<vmem>>, vector<1x512xf32>
    %c0_3 = arith.constant 0 : index
    %c640 = arith.constant 640 : index
    %5 = vector.load %arg6[%c0_3, %c640] : memref<1x768xf32, #tpu.memory_space<vmem>>, vector<1x128xf32>
    %c0_4 = arith.constant 0 : index
    %c0_5 = arith.constant 0 : index
    %c0_6 = arith.constant 0 : index
    %6 = vector.load %arg2[%c0_4, %c0_5, %c0_6] : memref<1x16x1024xf32, #tpu.memory_space<vmem>>, vector<1x16x1024xf32>
    %7 = vector.shape_cast %6 : vector<1x16x1024xf32> to vector<16x1024xf32>
    %8 = arith.truncf %7 : vector<16x1024xf32> to vector<16x1024xbf16>
    %c0_7 = arith.constant 0 : index
    %c0_8 = arith.constant 0 : index
    %9 = vector.load %arg3[%c0_7, %c0_8] : memref<1024x128xbf16, #tpu.memory_space<vmem>>, vector<1024x128xbf16>
    %cst = arith.constant dense<0.000000e+00> : vector<16x128xf32>
    %10 = tpu.matmul %8, %9, %cst {dimension_numbers = #tpu.dot_dimension_numbers<[1], [0], [0], [1], [0, 0, 1, 1], [], []>} : vector<16x1024xbf16>, vector<1024x128xbf16>, vector<16x128xf32> -> vector<16x128xf32>
    %11 = vector.broadcast %3 : vector<1x128xf32> to vector<16x128xf32>
    %12 = arith.addf %10, %11 : vector<16x128xf32>
    %cst_9 = arith.constant 0.000000e+00 : f32
    %13 = vector.broadcast %cst_9 : f32 to vector<16x128xf32>
    %14 = arith.maximumf %12, %13 : vector<16x128xf32>
    %c0_10 = arith.constant 0 : index
    %c0_11 = arith.constant 0 : index
    %15 = vector.load %arg9[%c0_10, %c0_11] : memref<16x256xf32, #tpu.memory_space<vmem>>, vector<16x128xf32>
    %c0_12 = arith.constant 0 : index
    %c128_13 = arith.constant 128 : index
    %16 = vector.load %arg9[%c0_12, %c128_13] : memref<16x256xf32, #tpu.memory_space<vmem>>, vector<16x128xf32>
    %17 = arith.truncf %14 : vector<16x128xf32> to vector<16x128xbf16>
    %18 = arith.truncf %15 : vector<16x128xf32> to vector<16x128xbf16>
    %19 = tpu.concatenate %17, %18 in 1 : vector<16x128xbf16>, vector<16x128xbf16> -> vector<16x256xbf16>
    %c0_14 = arith.constant 0 : index
    %c0_15 = arith.constant 0 : index
    %20 = vector.load %arg4[%c0_14, %c0_15] : memref<256x512xbf16, #tpu.memory_space<vmem>>, vector<256x512xbf16>
    %cst_16 = arith.constant dense<0.000000e+00> : vector<16x512xf32>
    %21 = tpu.matmul %19, %20, %cst_16 {dimension_numbers = #tpu.dot_dimension_numbers<[1], [0], [0], [1], [0, 0, 1, 1], [], []>} : vector<16x256xbf16>, vector<256x512xbf16>, vector<16x512xf32> -> vector<16x512xf32>
    %22 = vector.broadcast %4 : vector<1x512xf32> to vector<16x512xf32>
    %23 = arith.addf %21, %22 : vector<16x512xf32>
    %24 = vector.extract_strided_slice %23 {offsets = [0, 0], sizes = [16, 128], strides = [1, 1]} : vector<16x512xf32> to vector<16x128xf32>
    %cst_17 = arith.constant 5.000000e-01 : f32
    %25 = vector.broadcast %cst_17 : f32 to vector<16x128xf32>
    %26 = arith.mulf %25, %24 : vector<16x128xf32>
    %27 = math.tanh %26 : vector<16x128xf32>
    %cst_18 = arith.constant 1.000000e+00 : f32
    %28 = vector.broadcast %cst_18 : f32 to vector<16x128xf32>
    %29 = arith.addf %27, %28 : vector<16x128xf32>
    %cst_19 = arith.constant 5.000000e-01 : f32
    %30 = vector.broadcast %cst_19 : f32 to vector<16x128xf32>
    %31 = arith.mulf %30, %29 : vector<16x128xf32>
    %32 = vector.extract_strided_slice %23 {offsets = [0, 128], sizes = [16, 128], strides = [1, 1]} : vector<16x512xf32> to vector<16x128xf32>
    %cst_20 = arith.constant 5.000000e-01 : f32
    %33 = vector.broadcast %cst_20 : f32 to vector<16x128xf32>
    %34 = arith.mulf %33, %32 : vector<16x128xf32>
    %35 = math.tanh %34 : vector<16x128xf32>
    %cst_21 = arith.constant 1.000000e+00 : f32
    %36 = vector.broadcast %cst_21 : f32 to vector<16x128xf32>
    %37 = arith.addf %35, %36 : vector<16x128xf32>
    %cst_22 = arith.constant 5.000000e-01 : f32
    %38 = vector.broadcast %cst_22 : f32 to vector<16x128xf32>
    %39 = arith.mulf %38, %37 : vector<16x128xf32>
    %40 = vector.extract_strided_slice %23 {offsets = [0, 256], sizes = [16, 128], strides = [1, 1]} : vector<16x512xf32> to vector<16x128xf32>
    %41 = math.tanh %40 : vector<16x128xf32>
    %42 = vector.extract_strided_slice %23 {offsets = [0, 384], sizes = [16, 128], strides = [1, 1]} : vector<16x512xf32> to vector<16x128xf32>
    %cst_23 = arith.constant 5.000000e-01 : f32
    %43 = vector.broadcast %cst_23 : f32 to vector<16x128xf32>
    %44 = arith.mulf %43, %42 : vector<16x128xf32>
    %45 = math.tanh %44 : vector<16x128xf32>
    %cst_24 = arith.constant 1.000000e+00 : f32
    %46 = vector.broadcast %cst_24 : f32 to vector<16x128xf32>
    %47 = arith.addf %45, %46 : vector<16x128xf32>
    %cst_25 = arith.constant 5.000000e-01 : f32
    %48 = vector.broadcast %cst_25 : f32 to vector<16x128xf32>
    %49 = arith.mulf %48, %47 : vector<16x128xf32>
    %50 = arith.mulf %39, %16 : vector<16x128xf32>
    %51 = arith.mulf %31, %41 : vector<16x128xf32>
    %52 = arith.addf %50, %51 : vector<16x128xf32>
    %53 = math.tanh %52 : vector<16x128xf32>
    %54 = arith.mulf %49, %53 : vector<16x128xf32>
    %55 = arith.truncf %54 : vector<16x128xf32> to vector<16x128xbf16>
    %c0_26 = arith.constant 0 : index
    %c0_27 = arith.constant 0 : index
    %56 = vector.load %arg5[%c0_26, %c0_27] : memref<128x128xbf16, #tpu.memory_space<vmem>>, vector<128x128xbf16>
    %cst_28 = arith.constant dense<0.000000e+00> : vector<16x128xf32>
    %57 = tpu.matmul %55, %56, %cst_28 {dimension_numbers = #tpu.dot_dimension_numbers<[1], [0], [0], [1], [0, 0, 1, 1], [], []>} : vector<16x128xbf16>, vector<128x128xbf16>, vector<16x128xf32> -> vector<16x128xf32>
    %58 = vector.broadcast %5 : vector<1x128xf32> to vector<16x128xf32>
    %59 = arith.addf %57, %58 : vector<16x128xf32>
    %60 = tpu.iota {dimensions = array<i32: 1>} : vector<16x128xi32>
    %c8_i32 = arith.constant 8 : i32
    %61 = vector.broadcast %c8_i32 : i32 to vector<16x128xi32>
    %62 = arith.cmpi slt, %60, %61 : vector<16x128xi32>
    %cst_29 = arith.constant -1.000000e+30 : f32
    %63 = vector.broadcast %cst_29 : f32 to vector<16x128xf32>
    %64 = arith.select %62, %59, %63 : vector<16x128xi1>, vector<16x128xf32>
    %cst_30 = arith.constant dense<0xFF800000> : vector<16xf32>
    %65 = vector.multi_reduction <maximumf>, %64, %cst_30 [1] : vector<16x128xf32> to vector<16xf32>
    %66 = vector.shape_cast %65 : vector<16xf32> to vector<16x1xf32>
    %67 = vector.broadcast %66 : vector<16x1xf32> to vector<16x128xf32>
    %68 = arith.subf %64, %67 : vector<16x128xf32>
    %69 = math.exp %68 : vector<16x128xf32>
    %cst_31 = arith.constant dense<0.000000e+00> : vector<16xf32>
    %70 = vector.multi_reduction <add>, %69, %cst_31 [1] : vector<16x128xf32> to vector<16xf32>
    %71 = vector.shape_cast %70 : vector<16xf32> to vector<16x1xf32>
    %72 = math.log %71 : vector<16x1xf32>
    %73 = arith.addf %66, %72 : vector<16x1xf32>
    %74 = vector.broadcast %73 : vector<16x1xf32> to vector<16x128xf32>
    %75 = arith.subf %64, %74 : vector<16x128xf32>
    %76 = tpu.reciprocal %71 {approx = true} : vector<16x1xf32> -> vector<16x1xf32>
    %77 = vector.broadcast %76 : vector<16x1xf32> to vector<16x128xf32>
    %78 = arith.mulf %69, %77 : vector<16x128xf32>
    %79 = arith.mulf %75, %78 : vector<16x128xf32>
    %cst_32 = arith.constant 0.000000e+00 : f32
    %80 = vector.broadcast %cst_32 : f32 to vector<16x128xf32>
    %81 = arith.select %62, %79, %80 : vector<16x128xi1>, vector<16x128xf32>
    %cst_33 = arith.constant dense<0.000000e+00> : vector<16xf32>
    %82 = vector.multi_reduction <add>, %81, %cst_33 [1] : vector<16x128xf32> to vector<16xf32>
    %83 = vector.shape_cast %82 : vector<16xf32> to vector<16x1xf32>
    %cst_34 = arith.constant 0.000000e+00 : f32
    %84 = vector.broadcast %cst_34 : f32 to vector<16x1xf32>
    %85 = arith.subf %84, %83 : vector<16x1xf32>
    %cst_35 = arith.constant 0.000000e+00 : f32
    %86 = vector.broadcast %cst_35 : f32 to vector<16x128xf32>
    %87 = arith.select %62, %75, %86 : vector<16x128xi1>, vector<16x128xf32>
    %c8_i32_36 = arith.constant 8 : i32
    %88 = vector.broadcast %c8_i32_36 : i32 to vector<16x128xi32>
    %89 = arith.cmpi eq, %60, %88 : vector<16x128xi32>
    %90 = arith.select %89, %59, %87 : vector<16x128xi1>, vector<16x128xf32>
    %c9_i32 = arith.constant 9 : i32
    %91 = vector.broadcast %c9_i32 : i32 to vector<16x128xi32>
    %92 = arith.cmpi eq, %60, %91 : vector<16x128xi32>
    %93 = vector.shape_cast %85 : vector<16x1xf32> to vector<16x1xf32>
    %94 = vector.broadcast %93 : vector<16x1xf32> to vector<16x128xf32>
    %95 = arith.select %92, %94, %90 : vector<16x128xi1>, vector<16x128xf32>
    %c0_37 = arith.constant 0 : index
    %c0_38 = arith.constant 0 : index
    %c0_39 = arith.constant 0 : index
    %96 = vector.load %arg8[%c0_37, %c0_38, %c0_39] : memref<1x16x384xf32, #tpu.memory_space<vmem>>, vector<1x16x128xf32>
    %97 = vector.shape_cast %96 : vector<1x16x128xf32> to vector<16x128xf32>
    %98 = vector.shape_cast %95 : vector<16x128xf32> to vector<1x16x128xf32>
    tpu.vector_store %arg8[%c0_37, %c0_38, %c0_39], %98 {strides = array<i32>} : memref<1x16x384xf32, #tpu.memory_space<vmem>>, vector<1x16x128xf32>,
    %c0_40 = arith.constant 0 : index
    %c0_41 = arith.constant 0 : index
    %c128_42 = arith.constant 128 : index
    %99 = vector.load %arg8[%c0_40, %c0_41, %c128_42] : memref<1x16x384xf32, #tpu.memory_space<vmem>>, vector<1x16x128xf32>
    %100 = vector.shape_cast %99 : vector<1x16x128xf32> to vector<16x128xf32>
    %101 = vector.shape_cast %54 : vector<16x128xf32> to vector<1x16x128xf32>
    tpu.vector_store %arg8[%c0_40, %c0_41, %c128_42], %101 {strides = array<i32>} : memref<1x16x384xf32, #tpu.memory_space<vmem>>, vector<1x16x128xf32>,
    %c0_43 = arith.constant 0 : index
    %c0_44 = arith.constant 0 : index
    %c256 = arith.constant 256 : index
    %102 = vector.load %arg8[%c0_43, %c0_44, %c256] : memref<1x16x384xf32, #tpu.memory_space<vmem>>, vector<1x16x128xf32>
    %103 = vector.shape_cast %102 : vector<1x16x128xf32> to vector<16x128xf32>
    %104 = vector.shape_cast %52 : vector<16x128xf32> to vector<1x16x128xf32>
    tpu.vector_store %arg8[%c0_43, %c0_44, %c256], %104 {strides = array<i32>} : memref<1x16x384xf32, #tpu.memory_space<vmem>>, vector<1x16x128xf32>,
    %c0_45 = arith.constant 0 : index
    %c0_46 = arith.constant 0 : index
    %105 = vector.load %arg9[%c0_45, %c0_46] : memref<16x256xf32, #tpu.memory_space<vmem>>, vector<16x128xf32>
    tpu.vector_store %arg9[%c0_45, %c0_46], %54 {strides = array<i32>} : memref<16x256xf32, #tpu.memory_space<vmem>>, vector<16x128xf32>,
    %c0_47 = arith.constant 0 : index
    %c128_48 = arith.constant 128 : index
    %106 = vector.load %arg9[%c0_47, %c128_48] : memref<16x256xf32, #tpu.memory_space<vmem>>, vector<16x128xf32>
    tpu.vector_store %arg9[%c0_47, %c128_48], %52 {strides = array<i32>} : memref<16x256xf32, #tpu.memory_space<vmem>>, vector<16x128xf32>,
    return
  }
  func.func @transform_0(%arg0: i32, %arg1: i32) -> (i32, i32, i32) {
    %c0_i32 = arith.constant 0 : i32
    %c0_i32_0 = arith.constant 0 : i32
    return %arg1, %arg0, %c0_i32 : i32, i32, i32
  }
  func.func @transform_1(%arg0: i32, %arg1: i32) -> (i32, i32) {
    %c0_i32 = arith.constant 0 : i32
    %c0_i32_0 = arith.constant 0 : i32
    %c0_i32_1 = arith.constant 0 : i32
    return %c0_i32, %c0_i32_0 : i32, i32
  }
  func.func @transform_2(%arg0: i32, %arg1: i32) -> (i32, i32) {
    %c0_i32 = arith.constant 0 : i32
    %c0_i32_0 = arith.constant 0 : i32
    %c0_i32_1 = arith.constant 0 : i32
    return %c0_i32, %c0_i32_0 : i32, i32
  }
  func.func @transform_3(%arg0: i32, %arg1: i32) -> (i32, i32) {
    %c0_i32 = arith.constant 0 : i32
    %c0_i32_0 = arith.constant 0 : i32
    %c0_i32_1 = arith.constant 0 : i32
    return %c0_i32, %c0_i32_0 : i32, i32
  }
  func.func @transform_4(%arg0: i32, %arg1: i32) -> (i32, i32) {
    %c0_i32 = arith.constant 0 : i32
    %c0_i32_0 = arith.constant 0 : i32
    %c0_i32_1 = arith.constant 0 : i32
    return %c0_i32, %c0_i32_0 : i32, i32
  }
  func.func @transform_5(%arg0: i32, %arg1: i32) -> (i32, i32) {
    %c0_i32 = arith.constant 0 : i32
    %c0_i32_0 = arith.constant 0 : i32
    return %arg0, %c0_i32 : i32, i32
  }
  func.func @transform_6(%arg0: i32, %arg1: i32) -> (i32, i32, i32) {
    %c0_i32 = arith.constant 0 : i32
    %c0_i32_0 = arith.constant 0 : i32
    return %arg1, %arg0, %c0_i32 : i32, i32, i32
  }
}

</mosaic_0001>

<bundles_post_ra>
// kernel: _lstm_policy_core.1
= control target key start
LH: loop header
LB: loop body
LE: loop exit
PB: predicated region body
PF: predicated region fallthrough
CT: control target
= control target key end

     0   :  { %11 = vsyncpa [#allocation4], 0  ;;  %s2304_s0 = inlined_call_operand.hbm [shape: f32[1,16,1024], index: 0, kind: input, shape index: {}]   ;;  %s2305_s1 = inlined_call_operand.hbm [shape: bf16[1024,128], index: 1, kind: input, shape index: {}]   ;;  %s2306_s2 = inlined_call_operand.hbm [shape: bf16[256,512], index: 2, kind: input, shape index: {}]   ;;  %s2307_s3 = inlined_call_operand.hbm [shape: bf16[128,128], index: 3, kind: input, shape index: {}]   ;;  %s2308_s4 = inlined_call_operand.vmem [shape: f32[1,768], index: 4, kind: input, shape index: {}]   ;;  %s2309_s5 = inlined_call_operand.hbm [shape: f32[16,256], index: 5, kind: input, shape index: {}]   ;;  %s2310_s6 = inlined_call_operand.hbm [shape: f32[1,16,384], index: 6, kind: output, shape index: {}]  }
   0x1   :  { %12 = vsyncpa [#allocation7], 0 }
   0x2   :  { %13 = vsyncpa [#allocation10], 0 }
   0x3   :  { %14 = vsyncpa [#allocation5], 0  ;;  %s2149_s21 = smov [#allocation6]   ;;  %s2009_s25 = scalar_lea.hbm %s2305_s1, 8192 }
   0x4   :  { %s32_s22 = sshll.u32 %s2149_s21, 4  ;;  %p2010_p0 = scmp.ne.s32.totalorder %s2305_s1, %s2009_s25  ;;  %s33_s22 = int_to_ptr.vmem [resolvable:$true] %s32_s22 }
   0x5   :  { %p2013_p1 = scmp.lt.u32.totalorder %s2009_s25, %s2305_s1 }
   0x7   :  { %p2015_p2 = pnand %p2013_p1, %p2010_p0 }
   0x9   :  { %2018 = shalt.err (!%p2015_p2)
}
   0xa   :  { %s2019_s30 = scalar_lea.vmem %s33_s22, 8192  ;;  %p2024_p4 = scmp.lt.s32.totalorder %s33_s22, %s33_s22 }
   0xb   :  { %p2020_p3 = scmp.ne.s32.totalorder %s33_s22, %s2019_s30  ;;  %p2025_p5 = scmp.lt.s32.totalorder %s2019_s30, %s2019_s30 }
   0xd   :  { %p2026_p6 = por %p2025_p5, %p2024_p4 }
   0xf   :  { %p2027_p7 = pnand %p2026_p6, %p2020_p3 }
  0x11   :  { %2030 = shalt.err (!%p2027_p7)
}
  0x12   :  { %s2150_s7 = smov 64   ;;  %s2151_s8 = smov 4  }
  0x13   :  { %38 = dma.hbm_to_vmem [thread:$0]  %s2305_s1, 8192, %s33_s22, [#allocation7], %s2150_s7, %s2150_s7, %s2151_s8  }
  0x14   :  { %s2152_s11 = smov [#allocation9]   ;;  %s2153_s13 = smov [#allocation3]  }
  0x15   :  { %s56_s12 = sshll.u32 %s2152_s11, 4  ;;  %s20_s14 = sshll.u32 %s2153_s13, 4  ;;  %s57_s12 = int_to_ptr.vmem [resolvable:$true] %s56_s12  ;;  %s21_s14 = int_to_ptr.vmem [resolvable:$true] %s20_s14 }
  0x16   :  { %s2031_s17 = scalar_lea.hbm %s2307_s3, 1024 }
  0x17   :  { %p2032_p8 = scmp.ne.s32.totalorder %s2307_s3, %s2031_s17  ;;  %p2035_p9 = scmp.lt.u32.totalorder %s2031_s17, %s2307_s3 }
  0x19   :  { %p2037_p10 = pnand %p2035_p9, %p2032_p8 }
  0x1b   :  { %2040 = shalt.err (!%p2037_p10)
}
  0x1c   :  { %s2041_s1 = scalar_lea.vmem %s57_s12, 1024  ;;  %p2046_p12 = scmp.lt.s32.totalorder %s57_s12, %s57_s12 }
  0x1d   :  { %p2042_p11 = scmp.ne.s32.totalorder %s57_s12, %s2041_s1  ;;  %p2047_p13 = scmp.lt.s32.totalorder %s2041_s1, %s2041_s1 }
  0x1f   :  { %p2048_p0 = por %p2047_p13, %p2046_p12 }
  0x21   :  { %p2049_p1 = pnand %p2048_p0, %p2042_p11 }
  0x23   :  { %2052 = shalt.err (!%p2049_p1)
}
  0x24   :  { %62 = dma.hbm_to_vmem [thread:$0]  %s2307_s3, 1024, %s57_s12, [#allocation10], %s2150_s7, %s2150_s7, %s2151_s8  }
  0x25   :  { %s2053_s26 = scalar_lea.hbm %s2304_s0, 2048 }
  0x26   :  { %p2054_p2 = scmp.ne.s32.totalorder %s2304_s0, %s2053_s26  ;;  %p2057_p3 = scmp.lt.u32.totalorder %s2053_s26, %s2304_s0 }
  0x28   :  { %p2059_p4 = pnand %p2057_p3, %p2054_p2 }
  0x2a   :  { %2062 = shalt.err (!%p2059_p4)
}
  0x2b   :  { %s2063_s9 = scalar_lea.vmem %s21_s14, 2048  ;;  %p2068_p6 = scmp.lt.s32.totalorder %s21_s14, %s21_s14 }
  0x2c   :  { %p2064_p5 = scmp.ne.s32.totalorder %s21_s14, %s2063_s9  ;;  %p2069_p7 = scmp.lt.s32.totalorder %s2063_s9, %s2063_s9 }
  0x2e   :  { %p2070_p8 = por %p2069_p7, %p2068_p6 }
  0x30   :  { %p2071_p9 = pnand %p2070_p8, %p2064_p5 }
  0x32   :  { %2074 = shalt.err (!%p2071_p9)
}
  0x33   :  { %s2154_s3 = smov 1024   ;;  %s2155_s11 = smov [#allocation8]  }
  0x34   :  { %26 = dma.hbm_to_vmem [thread:$0]  %s2304_s0, 2048, %s21_s14, [#allocation4], %s2154_s3, %s2154_s3, %s2150_s7  }
  0x35   :  { %s44_s12 = sshll.u32 %s2155_s11, 4  ;;  %s2075_s16 = scalar_lea.hbm %s2306_s2, 8192  ;;  %s45_s12 = int_to_ptr.vmem [resolvable:$true] %s44_s12 }
  0x36   :  { %p2076_p10 = scmp.ne.s32.totalorder %s2306_s2, %s2075_s16  ;;  %p2079_p11 = scmp.lt.u32.totalorder %s2075_s16, %s2306_s2 }
  0x38   :  { %p2081_p12 = pnand %p2079_p11, %p2076_p10 }
  0x3a   :  { %2084 = shalt.err (!%p2081_p12)
}
  0x3b   :  { %s2085_s21 = scalar_lea.vmem %s45_s12, 8192  ;;  %p2090_p0 = scmp.lt.s32.totalorder %s45_s12, %s45_s12 }
  0x3c   :  { %p2086_p13 = scmp.ne.s32.totalorder %s45_s12, %s2085_s21  ;;  %p2091_p1 = scmp.lt.s32.totalorder %s2085_s21, %s2085_s21 }
  0x3e   :  { %p2092_p2 = por %p2091_p1, %p2090_p0 }
  0x40   :  { %p2093_p3 = pnand %p2092_p2, %p2086_p13 }
  0x42   :  { %2096 = shalt.err (!%p2093_p3)
}
  0x43   :  { %s2156_s0 = smov 256   ;;  %s2157_s7 = smov 16  }
  0x44   :  { %50 = dma.hbm_to_vmem [thread:$0]  %s2306_s2, 8192, %s45_s12, [#allocation7], %s2156_s0, %s2156_s0, %s2157_s7  }
  0x45   :  { %s2158_s22 = smov [#allocation11]   ;;  %s2097_s26 = scalar_lea.hbm %s2309_s5, 512 }
  0x46   :  { %s70_s23 = sshll.u32 %s2158_s22, 4  ;;  %p2098_p4 = scmp.ne.s32.totalorder %s2309_s5, %s2097_s26  ;;  %s71_s23 = int_to_ptr.vmem [resolvable:$true] %s70_s23 }
  0x47   :  { %p2101_p5 = scmp.lt.u32.totalorder %s2097_s26, %s2309_s5 }
  0x49   :  { %p2103_p6 = pnand %p2101_p5, %p2098_p4 }
  0x4b   :  { %2106 = shalt.err (!%p2103_p6)
}
  0x4c   :  { %s2107_s9 = scalar_lea.vmem %s71_s23, 512  ;;  %p2112_p8 = scmp.lt.s32.totalorder %s71_s23, %s71_s23 }
  0x4d   :  { %p2108_p7 = scmp.ne.s32.totalorder %s71_s23, %s2107_s9  ;;  %p2113_p9 = scmp.lt.s32.totalorder %s2107_s9, %s2107_s9 }
  0x4f   :  { %p2114_p10 = por %p2113_p9, %p2112_p8 }
  0x51   :  { %p2115_p11 = pnand %p2114_p10, %p2108_p7 }
  0x53   :  { %2118 = shalt.err (!%p2115_p11)
}
  0x54   :  { %76 = dma.hbm_to_vmem [thread:$0]  %s2309_s5, 512, %s71_s23, [#allocation10], %s2156_s0, %s2156_s0, %s2157_s7  }
  0x55   :  { %2141 = dma.done.wait [#allocation4], 2048  }
  0x56   :  { %2142 = vsyncadd [#allocation4], 4294965248 }
  0x57   :  { %2143 = dma.done.wait [#allocation7], 16384  }
  0x58   :  { %2144 = vsyncadd [#allocation7], 4294950912 }
  0x59   :  { %2145 = dma.done.wait [#allocation10], 1536  }
  0x5a   :  { %2146 = vsyncadd [#allocation10], 4294965760  ;;  %v1809_v0 = vld [vmem:[#allocation6 + $0x40] sm:$0xff]   ;;  %v1813_v4 = vld [vmem:[#allocation6 + $0x48] sm:$0xff]   ;;  %vm2160_vm0 = vmmov 0  }
  0x5b   :  { %v1810_v1 = vld [vmem:[#allocation6 + $0xc0] sm:$0xff]   ;;  %1677 = vmatprep.subr.bf16.mxu0 %v1809_v0  ;;  %v1814_v5 = vld [vmem:[#allocation6 + $0xc8] sm:$0xff]   ;;  %v1817_v8 = vld [vmem:[#allocation6 + $0x50] sm:$0xff]  }
  0x5c   :  { %v1811_v2 = vld [vmem:[#allocation6] sm:$0xff]   ;;  %1699 = vmatprep.subr.bf16.mxu1 %v1810_v1  ;;  %v1815_v6 = vld [vmem:[#allocation6 + $0x8] sm:$0xff]   ;;  %v1818_v9 = vld [vmem:[#allocation6 + $0xd0] sm:$0xff]  }
  0x5d   :  { %v1812_v3 = vld [vmem:[#allocation6 + $0x80] sm:$0xff]   ;;  %1678 = vmatpush3.bf16.msra.mxu0 %v1811_v2  ;;  %v1816_v7 = vld [vmem:[#allocation6 + $0x88] sm:$0xff]   ;;  %v1819_v10 = vld [vmem:[#allocation6 + $0x10] sm:$0xff]  }
  0x5e   :  { %1700 = vmatpush3.bf16.msra.mxu1 %v1812_v3  ;;  %1679 = vmatprep.subr.bf16.mxu0 %v1813_v4  ;;  %v1820_v11 = vld [vmem:[#allocation6 + $0x90] sm:$0xff]   ;;  %v1821_v12 = vld [vmem:[#allocation6 + $0x58] sm:$0xff]   ;;  %v1825_v16 = vld [vmem:[#allocation6 + $0x60] sm:$0xff]  }
  0x5f   :  { %1701 = vmatprep.subr.bf16.mxu1 %v1814_v5  ;;  %v1822_v13 = vld [vmem:[#allocation6 + $0xd8] sm:$0xff]   ;;  %v1826_v17 = vld [vmem:[#allocation6 + $0xe0] sm:$0xff]   ;;  %v1829_v20 = vld [vmem:[#allocation6 + $0x68] sm:$0xff]  }
  0x60   :  { %v1823_v14 = vld [vmem:[#allocation6 + $0x18] sm:$0xff]   ;;  %v1827_v18 = vld [vmem:[#allocation6 + $0x20] sm:$0xff]   ;;  %v1830_v21 = vld [vmem:[#allocation6 + $0xe8] sm:$0xff]  }
  0x61   :  { %1680 = vmatpush3.bf16.msra.mxu0 %v1815_v6  ;;  %v1824_v15 = vld [vmem:[#allocation6 + $0x98] sm:$0xff]   ;;  %v1828_v19 = vld [vmem:[#allocation6 + $0xa0] sm:$0xff]   ;;  %v1831_v22 = vld [vmem:[#allocation6 + $0x28] sm:$0xff]  }
  0x62   :  { %1702 = vmatpush3.bf16.msra.mxu1 %v1816_v7  ;;  %1681 = vmatprep.subr.bf16.mxu0 %v1817_v8  ;;  %v1832_v23 = vld [vmem:[#allocation6 + $0xa8] sm:$0xff]   ;;  %v1833_v24 = vld [vmem:[#allocation6 + $0x70] sm:$0xff]   ;;  %v1837_v28 = vld [vmem:[#allocation6 + $0x78] sm:$0xff]  }
  0x63   :  { %1703 = vmatprep.subr.bf16.mxu1 %v1818_v9  ;;  %v1834_v25 = vld [vmem:[#allocation6 + $0xf0] sm:$0xff]   ;;  %v1838_v29 = vld [vmem:[#allocation6 + $0xf8] sm:$0xff]   ;;  %v109_v32 = vld [vmem:[#allocation3 + $0x8] sm:$0xff] }
  0x64   :  { %v1835_v26 = vld [vmem:[#allocation6 + $0x30] sm:$0xff]   ;;  %v1839_v30 = vld [vmem:[#allocation6 + $0x38] sm:$0xff]   ;;  %v117_v33 = vld [vmem:[#allocation3 + $0x48] sm:$0xff] }
  0x65   :  { %1682 = vmatpush3.bf16.msra.mxu0 %v1819_v10  ;;  %v1836_v27 = vld [vmem:[#allocation6 + $0xb0] sm:$0xff]   ;;  %v1840_v31 = vld [vmem:[#allocation6 + $0xb8] sm:$0xff]   ;;  %v125_v35 = vpack.c.bf16 %v117_v33, %v109_v32  ;;  %v108_v37 = vld [vmem:[#allocation3] sm:$0xff] }
  0x66   :  { %1704 = vmatpush3.bf16.msra.mxu1 %v1820_v11  ;;  %1683 = vmatprep.subr.bf16.mxu0 %v1821_v12  ;;  %v111_v34 = vld [vmem:[#allocation3 + $0x18] sm:$0xff]  ;;  %v116_v38 = vld [vmem:[#allocation3 + $0x40] sm:$0xff]  ;;  %v110_v41 = vld [vmem:[#allocation3 + $0x10] sm:$0xff] }
  0x67   :  { %1705 = vmatprep.subr.bf16.mxu1 %v1822_v13  ;;  %v119_v36 = vld [vmem:[#allocation3 + $0x58] sm:$0xff]  ;;  %v124_v40 = vpack.c.bf16 %v116_v38, %v108_v37  ;;  %v118_v42 = vld [vmem:[#allocation3 + $0x50] sm:$0xff]  ;;  %682 = vmatprep.mubr.bf16.mxu0 %v125_v35  ;;  %v1841_v44 = vld [vmem:[#allocation6 + $0x140] sm:$0xff]  }
  0x68   :  { %v127_v39 = vpack.c.bf16 %v119_v36, %v111_v34  ;;  %v126_v43 = vpack.c.bf16 %v118_v42, %v110_v41  ;;  %v1842_v45 = vld [vmem:[#allocation6 + $0x1c0] sm:$0xff]   ;;  %v1845_v48 = vld [vmem:[#allocation6 + $0x148] sm:$0xff]   ;;  %v1849_v52 = vld [vmem:[#allocation6 + $0x150] sm:$0xff]  }
  0x69   :  { %1684 = vmatpush3.bf16.msra.mxu0 %v1823_v14  ;;  %v1843_v46 = vld [vmem:[#allocation6 + $0x100] sm:$0xff]   ;;  %v1846_v49 = vld [vmem:[#allocation6 + $0x1c8] sm:$0xff]   ;;  %v1850_v53 = vld [vmem:[#allocation6 + $0x1d0] sm:$0xff]  }
  0x6a   :  { %1706 = vmatpush3.bf16.msra.mxu1 %v1824_v15  ;;  %1685 = vmatprep.subr.bf16.mxu0 %v1825_v16  ;;  %v1844_v47 = vld [vmem:[#allocation6 + $0x180] sm:$0xff]   ;;  %v1847_v50 = vld [vmem:[#allocation6 + $0x108] sm:$0xff]   ;;  %v1851_v54 = vld [vmem:[#allocation6 + $0x110] sm:$0xff]  }
  0x6b   :  { %1707 = vmatprep.subr.bf16.mxu1 %v1826_v17  ;;  %723 = vmatprep.mubr.bf16.mxu1 %v127_v39  ;;  %v1848_v51 = vld [vmem:[#allocation6 + $0x188] sm:$0xff]   ;;  %v1852_v55 = vld [vmem:[#allocation6 + $0x190] sm:$0xff]   ;;  %v1853_v56 = vld [vmem:[#allocation6 + $0x158] sm:$0xff]  }
  0x6c   :  { %v1854_v57 = vld [vmem:[#allocation6 + $0x1d8] sm:$0xff]   ;;  %v1857_v60 = vld [vmem:[#allocation6 + $0x160] sm:$0xff]   ;;  %v1861_v0 = vld [vmem:[#allocation6 + $0x168] sm:$0xff]  }
  0x6d   :  { %1686 = vmatpush3.bf16.msra.mxu0 %v1827_v18  ;;  %v1855_v58 = vld [vmem:[#allocation6 + $0x118] sm:$0xff]   ;;  %v1858_v61 = vld [vmem:[#allocation6 + $0x1e0] sm:$0xff]   ;;  %v1862_v1 = vld [vmem:[#allocation6 + $0x1e8] sm:$0xff]  }
  0x6e   :  { %1708 = vmatpush3.bf16.msra.mxu1 %v1828_v19  ;;  %1687 = vmatprep.subr.bf16.mxu0 %v1829_v20  ;;  %v1856_v59 = vld [vmem:[#allocation6 + $0x198] sm:$0xff]   ;;  %v1859_v62 = vld [vmem:[#allocation6 + $0x120] sm:$0xff]   ;;  %v1863_v2 = vld [vmem:[#allocation6 + $0x128] sm:$0xff]  }
  0x6f   :  { %1709 = vmatprep.subr.bf16.mxu1 %v1830_v21  ;;  %v1860_v63 = vld [vmem:[#allocation6 + $0x1a0] sm:$0xff]   ;;  %v1864_v3 = vld [vmem:[#allocation6 + $0x1a8] sm:$0xff]   ;;  %v1865_v4 = vld [vmem:[#allocation6 + $0x170] sm:$0xff]  }
  0x70   :  { %v1866_v5 = vld [vmem:[#allocation6 + $0x1f0] sm:$0xff]   ;;  %v1869_v8 = vld [vmem:[#allocation6 + $0x178] sm:$0xff]   ;;  %v113_v12 = vld [vmem:[#allocation3 + $0x28] sm:$0xff] }
  0x71   :  { %1688 = vmatpush3.bf16.msra.mxu0 %v1831_v22  ;;  %v1867_v6 = vld [vmem:[#allocation6 + $0x130] sm:$0xff]   ;;  %v1870_v9 = vld [vmem:[#allocation6 + $0x1f8] sm:$0xff]   ;;  %v121_v13 = vld [vmem:[#allocation3 + $0x68] sm:$0xff] }
  0x72   :  { %1710 = vmatpush3.bf16.msra.mxu1 %v1832_v23  ;;  %1689 = vmatprep.subr.bf16.mxu0 %v1833_v24  ;;  %v1868_v7 = vld [vmem:[#allocation6 + $0x1b0] sm:$0xff]   ;;  %v1871_v10 = vld [vmem:[#allocation6 + $0x138] sm:$0xff]   ;;  %v129_v16 = vpack.c.bf16 %v121_v13, %v113_v12  ;;  %v112_v18 = vld [vmem:[#allocation3 + $0x20] sm:$0xff] }
  0x73   :  { %1711 = vmatprep.subr.bf16.mxu1 %v1834_v25  ;;  %v1872_v11 = vld [vmem:[#allocation6 + $0x1b8] sm:$0xff]   ;;  %v120_v19 = vld [vmem:[#allocation3 + $0x60] sm:$0xff]  ;;  %v114_v20 = vld [vmem:[#allocation3 + $0x30] sm:$0xff] }
  0x74   :  { %v115_v14 = vld [vmem:[#allocation3 + $0x38] sm:$0xff]  ;;  %v128_v21 = vpack.c.bf16 %v120_v19, %v112_v18  ;;  %v122_v22 = vld [vmem:[#allocation3 + $0x70] sm:$0xff] }
  0x75   :  { %1690 = vmatpush3.bf16.msra.mxu0 %v1835_v26  ;;  %v123_v15 = vld [vmem:[#allocation3 + $0x78] sm:$0xff]  ;;  %v130_v23 = vpack.c.bf16 %v122_v22, %v114_v20  ;;  %v1873_v24 = vld [vmem:[#allocation8] ss:$16 sps:$4 sm:$0xff]   ;;  %v1875_v25 = vld [vmem:[#allocation8 + $0x4] ss:$16 sps:$4 sm:$0xff]  }
  0x76   :  { %1712 = vmatpush3.bf16.msra.mxu1 %v1836_v27  ;;  %1691 = vmatprep.subr.bf16.mxu0 %v1837_v28  ;;  %v131_v17 = vpack.c.bf16 %v123_v15, %v115_v14  ;;  %v1876_v26 = vld [vmem:[#allocation8 + $0x8] ss:$16 sps:$4 sm:$0xff]   ;;  %v1878_v27 = vld [vmem:[#allocation8 + $0xc] ss:$16 sps:$4 sm:$0xff]   ;;  %v1879_v28 = vld [vmem:[#allocation8 + $0x20] ss:$16 sps:$4 sm:$0xff]  }
  0x77   :  { %1713 = vmatprep.subr.bf16.mxu1 %v1838_v29  ;;  %v1881_v29 = vld [vmem:[#allocation8 + $0x24] ss:$16 sps:$4 sm:$0xff]   ;;  %v1885_v33 = vld [vmem:[#allocation8 + $0x40] ss:$16 sps:$4 sm:$0xff]   ;;  %v1890_v34 = vld [vmem:[#allocation8 + $0x4c] ss:$16 sps:$4 sm:$0xff]  }
  0x78   :  { %v1887_v32 = vld [vmem:[#allocation8 + $0x44] ss:$16 sps:$4 sm:$0xff]   ;;  %v1888_v35 = vld [vmem:[#allocation8 + $0x48] ss:$16 sps:$4 sm:$0xff]   ;;  %v1896_v37 = vld [vmem:[#allocation8 + $0x6c] ss:$16 sps:$4 sm:$0xff]  }
  0x79   :  { %1692 = vmatpush3.bf16.msra.mxu0 %v1839_v30  ;;  %v1882_v30 = vld [vmem:[#allocation8 + $0x28] ss:$16 sps:$4 sm:$0xff]   ;;  %v1893_v36 = vld [vmem:[#allocation8 + $0x64] ss:$16 sps:$4 sm:$0xff]   ;;  %v1891_v38 = vld [vmem:[#allocation8 + $0x60] ss:$16 sps:$4 sm:$0xff]  }
  0x7a   :  { %1714 = vmatpush3.bf16.msra.mxu1 %v1840_v31  ;;  %1721 = vmatprep.subr.bf16.mxu0 %v1841_v44  ;;  %v1884_v31 = vld [vmem:[#allocation8 + $0x2c] ss:$16 sps:$4 sm:$0xff]   ;;  %v1894_v39 = vld [vmem:[#allocation8 + $0x68] ss:$16 sps:$4 sm:$0xff]   ;;  %v1897_v42 = vld [vmem:[#allocation8 + $0x80] ss:$16 sps:$4 sm:$0xff]  }
  0x7b   :  { %1743 = vmatprep.subr.bf16.mxu1 %v1842_v45  ;;  %v1902_v41 = vld [vmem:[#allocation8 + $0x8c] ss:$16 sps:$4 sm:$0xff]   ;;  %v1905_v44 = vld [vmem:[#allocation8 + $0xa4] ss:$16 sps:$4 sm:$0xff]   ;;  %v1951_v14 = vld [vmem:[#allocation8 + $0x1a0] ss:$16 sps:$4 sm:$0xff]  }
  0x7c   :  { %683 = vmatmul.mubr.bf16.vlgmr.msra.gmra.mrb[0].mxu0 %v124_v40  ;;  %v1899_v40 = vld [vmem:[#allocation8 + $0x84] ss:$16 sps:$4 sm:$0xff]   ;;  %v1908_v45 = vld [vmem:[#allocation8 + $0xac] ss:$16 sps:$4 sm:$0xff]   ;;  %v1954_v15 = vld [vmem:[#allocation8 + $0x1a8] ss:$16 sps:$4 sm:$0xff]  }
  0x7d   :  { %724 = vmatmul.mubr.bf16.vlgmr.msra.gmra.mrb[0].mxu1 %v126_v43  ;;  %1722 = vmatpush3.bf16.msra.mxu0 %v1843_v46  ;;  %v1900_v43 = vld [vmem:[#allocation8 + $0x88] ss:$16 sps:$4 sm:$0xff]   ;;  %v1903_v46 = vld [vmem:[#allocation8 + $0xa0] ss:$16 sps:$4 sm:$0xff]   ;;  %v1953_v12 = vld [vmem:[#allocation8 + $0x1a4] ss:$16 sps:$4 sm:$0xff]  }
  0x7e   :  { %1744 = vmatpush3.bf16.msra.mxu1 %v1844_v47  ;;  %1723 = vmatprep.subr.bf16.mxu0 %v1845_v48  ;;  %v1906_v47 = vld [vmem:[#allocation8 + $0xa8] ss:$16 sps:$4 sm:$0xff]   ;;  %v1909_v48 = vld [vmem:[#allocation8 + $0xc0] ss:$16 sps:$4 sm:$0xff]   ;;  %v1956_v13 = vld [vmem:[#allocation8 + $0x1ac] ss:$16 sps:$4 sm:$0xff]  }
  0x7f   :  { %1745 = vmatprep.subr.bf16.mxu1 %v1846_v49  ;;  %764 = vmatprep.mubr.bf16.mxu0 %v129_v16  ;;  %v1911_v49 = vld [vmem:[#allocation8 + $0xc4] ss:$16 sps:$4 sm:$0xff]   ;;  %v1957_v18 = vld [vmem:[#allocation8 + $0x1c0] ss:$16 sps:$4 sm:$0xff]   ;;  %v1960_v19 = vld [vmem:[#allocation8 + $0x1c8] ss:$16 sps:$4 sm:$0xff]  }
  0x80   :  { %805 = vmatprep.mubr.bf16.mxu1 %v131_v17  ;;  %v1959_v16 = vld [vmem:[#allocation8 + $0x1c4] ss:$16 sps:$4 sm:$0xff]   ;;  %v1962_v17 = vld [vmem:[#allocation8 + $0x1cc] ss:$16 sps:$4 sm:$0xff]   ;;  %v1963_v22 = vld [vmem:[#allocation8 + $0x1e0] ss:$16 sps:$4 sm:$0xff]  }
  0x81   :  { %1724 = vmatpush3.bf16.msra.mxu0 %v1847_v50  ;;  %v1912_v50 = vld [vmem:[#allocation8 + $0xc8] ss:$16 sps:$4 sm:$0xff]   ;;  %v1965_v20 = vld [vmem:[#allocation8 + $0x1e4] ss:$16 sps:$4 sm:$0xff]  }
  0x82   :  { %1746 = vmatpush3.bf16.msra.mxu1 %v1848_v51  ;;  %1725 = vmatprep.subr.bf16.mxu0 %v1849_v52  ;;  %v1914_v51 = vld [vmem:[#allocation8 + $0xcc] ss:$16 sps:$4 sm:$0xff]   ;;  %v1917_v52 = vld [vmem:[#allocation8 + $0xe4] ss:$16 sps:$4 sm:$0xff]  }
  0x83   :  { %1747 = vmatprep.subr.bf16.mxu1 %v1850_v53  ;;  %v1920_v53 = vld [vmem:[#allocation8 + $0xec] ss:$16 sps:$4 sm:$0xff]  }
  0x85   :  { %1726 = vmatpush3.bf16.msra.mxu0 %v1851_v54  ;;  %v1915_v54 = vld [vmem:[#allocation8 + $0xe0] ss:$16 sps:$4 sm:$0xff]  }
  0x86   :  { %1748 = vmatpush3.bf16.msra.mxu1 %v1852_v55  ;;  %1727 = vmatprep.subr.bf16.mxu0 %v1853_v56  ;;  %v1918_v55 = vld [vmem:[#allocation8 + $0xe8] ss:$16 sps:$4 sm:$0xff]   ;;  %v1923_v56 = vld [vmem:[#allocation8 + $0x104] ss:$16 sps:$4 sm:$0xff]  }
  0x87   :  { %1749 = vmatprep.subr.bf16.mxu1 %v1854_v57  ;;  %v1926_v57 = vld [vmem:[#allocation8 + $0x10c] ss:$16 sps:$4 sm:$0xff]  }
  0x89   :  { %1728 = vmatpush3.bf16.msra.mxu0 %v1855_v58  ;;  %v1921_v58 = vld [vmem:[#allocation8 + $0x100] ss:$16 sps:$4 sm:$0xff]  }
  0x8a   :  { %1750 = vmatpush3.bf16.msra.mxu1 %v1856_v59  ;;  %1729 = vmatprep.subr.bf16.mxu0 %v1857_v60  ;;  %v1924_v59 = vld [vmem:[#allocation8 + $0x108] ss:$16 sps:$4 sm:$0xff]   ;;  %v1929_v60 = vld [vmem:[#allocation8 + $0x124] ss:$16 sps:$4 sm:$0xff]  }
  0x8b   :  { %1751 = vmatprep.subr.bf16.mxu1 %v1858_v61  ;;  %v1932_v61 = vld [vmem:[#allocation8 + $0x12c] ss:$16 sps:$4 sm:$0xff]  }
  0x8d   :  { %1730 = vmatpush3.bf16.msra.mxu0 %v1859_v62  ;;  %v1927_v62 = vld [vmem:[#allocation8 + $0x120] ss:$16 sps:$4 sm:$0xff]  }
  0x8e   :  { %1752 = vmatpush3.bf16.msra.mxu1 %v1860_v63  ;;  %1731 = vmatprep.subr.bf16.mxu0 %v1861_v0  ;;  %v1930_v63 = vld [vmem:[#allocation8 + $0x128] ss:$16 sps:$4 sm:$0xff]   ;;  %v1935_v0 = vld [vmem:[#allocation8 + $0x144] ss:$16 sps:$4 sm:$0xff]  }
  0x8f   :  { %1753 = vmatprep.subr.bf16.mxu1 %v1862_v1  ;;  %v1938_v1 = vld [vmem:[#allocation8 + $0x14c] ss:$16 sps:$4 sm:$0xff]  }
  0x91   :  { %1732 = vmatpush3.bf16.msra.mxu0 %v1863_v2  ;;  %v1933_v2 = vld [vmem:[#allocation8 + $0x140] ss:$16 sps:$4 sm:$0xff]  }
  0x92   :  { %1754 = vmatpush3.bf16.msra.mxu1 %v1864_v3  ;;  %1733 = vmatprep.subr.bf16.mxu0 %v1865_v4  ;;  %v1936_v3 = vld [vmem:[#allocation8 + $0x148] ss:$16 sps:$4 sm:$0xff]   ;;  %v1941_v4 = vld [vmem:[#allocation8 + $0x164] ss:$16 sps:$4 sm:$0xff]  }
  0x93   :  { %1755 = vmatprep.subr.bf16.mxu1 %v1866_v5  ;;  %v1944_v5 = vld [vmem:[#allocation8 + $0x16c] ss:$16 sps:$4 sm:$0xff]  }
  0x95   :  { %1734 = vmatpush3.bf16.msra.mxu0 %v1867_v6  ;;  %v1939_v6 = vld [vmem:[#allocation8 + $0x160] ss:$16 sps:$4 sm:$0xff]  }
  0x96   :  { %1756 = vmatpush3.bf16.msra.mxu1 %v1868_v7  ;;  %1735 = vmatprep.subr.bf16.mxu0 %v1869_v8  ;;  %v1942_v7 = vld [vmem:[#allocation8 + $0x168] ss:$16 sps:$4 sm:$0xff]   ;;  %v1947_v8 = vld [vmem:[#allocation8 + $0x184] ss:$16 sps:$4 sm:$0xff]  }
  0x97   :  { %1757 = vmatprep.subr.bf16.mxu1 %v1870_v9  ;;  %v1950_v9 = vld [vmem:[#allocation8 + $0x18c] ss:$16 sps:$4 sm:$0xff]  }
  0x99   :  { %1736 = vmatpush3.bf16.msra.mxu0 %v1871_v10  ;;  %v1945_v10 = vld [vmem:[#allocation8 + $0x180] ss:$16 sps:$4 sm:$0xff]  }
  0x9a   :  { %1758 = vmatpush3.bf16.msra.mxu1 %v1872_v11  ;;  %1227 = vmatprep.subr.bf16.mxu0 %v1875_v25  ;;  %v1948_v11 = vld [vmem:[#allocation8 + $0x188] ss:$16 sps:$4 sm:$0xff]   ;;  %v99_v25 = vld [vmem:[#allocation11 + $0x10] sm:$0xff] }
  0x9b   :  { %1270 = vmatprep.subr.bf16.mxu1 %v1878_v27 }
  0x9c   :  { %765 = vmatmul.mubr.bf16.vlgmr.msra.gmra.mrb[4].mxu0 %v128_v21  ;;  %v1968_v21 = vld [vmem:[#allocation8 + $0x1ec] ss:$16 sps:$4 sm:$0xff]  }
  0x9d   :  { %806 = vmatmul.mubr.bf16.vlgmr.msra.gmra.mrb[4].mxu1 %v130_v23  ;;  %1228 = vmatpush1.bf16.msra.mxu0 %v1873_v24  ;;  %v1966_v23 = vld [vmem:[#allocation8 + $0x1e8] ss:$16 sps:$4 sm:$0xff]   ;;  %v97_v24 = vld [vmem:[#allocation11] sm:$0xff] }
  0x9e   :  { %1271 = vmatpush1.bf16.msra.mxu1 %v1876_v26  ;;  %1229 = vmatprep.subr.bf16.mxu0 %v1881_v29  ;;  %v821_v26 = vpack.c.bf16 %v99_v25, %v97_v24  ;;  %v1539_v29 = vld [vmem:[%s2308_s4] ss:$0 sm:$0xff] }
  0x9f   :  { %1272 = vmatprep.subr.bf16.mxu1 %v1884_v31 }
  0xa0   :  { %1259 = vmatprep.mubr.bf16.mxu0 %v821_v26  ;;  %1302 = vmatprep.mubr.bf16.mxu1 %v821_v26 }
  0xa1   :  { %1230 = vmatpush1.bf16.msra.mxu0 %v1879_v28 }
  0xa2   :  { %1273 = vmatpush1.bf16.msra.mxu1 %v1882_v30  ;;  %1231 = vmatprep.subr.bf16.mxu0 %v1887_v32 }
  0xa3   :  { %1274 = vmatprep.subr.bf16.mxu1 %v1890_v34 }
  0xa5   :  { %1232 = vmatpush1.bf16.msra.mxu0 %v1885_v33 }
  0xa6   :  { %1275 = vmatpush1.bf16.msra.mxu1 %v1888_v35  ;;  %1233 = vmatprep.subr.bf16.mxu0 %v1893_v36 }
  0xa7   :  { %1276 = vmatprep.subr.bf16.mxu1 %v1896_v37 }
  0xa9   :  { %1234 = vmatpush1.bf16.msra.mxu0 %v1891_v38 }
  0xaa   :  { %1277 = vmatpush1.bf16.msra.mxu1 %v1894_v39  ;;  %1235 = vmatprep.subr.bf16.mxu0 %v1899_v40 }
  0xab   :  { %1278 = vmatprep.subr.bf16.mxu1 %v1902_v41 }
  0xad   :  { %1236 = vmatpush1.bf16.msra.mxu0 %v1897_v42 }
  0xae   :  { %1279 = vmatpush1.bf16.msra.mxu1 %v1900_v43  ;;  %1237 = vmatprep.subr.bf16.mxu0 %v1905_v44 }
  0xaf   :  { %1280 = vmatprep.subr.bf16.mxu1 %v1908_v45 }
  0xb1   :  { %1238 = vmatpush1.bf16.msra.mxu0 %v1903_v46 }
  0xb2   :  { %1281 = vmatpush1.bf16.msra.mxu1 %v1906_v47  ;;  %1239 = vmatprep.subr.bf16.mxu0 %v1911_v49 }
  0xb3   :  { %1282 = vmatprep.subr.bf16.mxu1 %v1914_v51 }
  0xb5   :  { %1240 = vmatpush1.bf16.msra.mxu0 %v1909_v48 }
  0xb6   :  { %1283 = vmatpush1.bf16.msra.mxu1 %v1912_v50  ;;  %1241 = vmatprep.subr.bf16.mxu0 %v1917_v52 }
  0xb7   :  { %1284 = vmatprep.subr.bf16.mxu1 %v1920_v53 }
  0xb9   :  { %1242 = vmatpush1.bf16.msra.mxu0 %v1915_v54 }
  0xba   :  { %1285 = vmatpush1.bf16.msra.mxu1 %v1918_v55  ;;  %1243 = vmatprep.subr.bf16.mxu0 %v1923_v56 }
  0xbb   :  { %1286 = vmatprep.subr.bf16.mxu1 %v1926_v57 }
  0xbd   :  { %1244 = vmatpush1.bf16.msra.mxu0 %v1921_v58 }
  0xbe   :  { %1287 = vmatpush1.bf16.msra.mxu1 %v1924_v59  ;;  %1245 = vmatprep.subr.bf16.mxu0 %v1929_v60 }
  0xbf   :  { %1288 = vmatprep.subr.bf16.mxu1 %v1932_v61 }
  0xc1   :  { %1246 = vmatpush1.bf16.msra.mxu0 %v1927_v62 }
  0xc2   :  { %1289 = vmatpush1.bf16.msra.mxu1 %v1930_v63  ;;  %1247 = vmatprep.subr.bf16.mxu0 %v1935_v0  ;;  %v1969_v63 = vld [vmem:[#allocation9] sm:$0xff]   ;;  %v2159_v0 = vmov 0.0  }
  0xc3   :  { %1290 = vmatprep.subr.bf16.mxu1 %v1938_v1  ;;  %v1970_v1 = vld [vmem:[#allocation9 + $0x8] sm:$0xff]  }
  0xc5   :  { %1248 = vmatpush1.bf16.msra.mxu0 %v1933_v2  ;;  %v1971_v2 = vld [vmem:[#allocation9 + $0x10] sm:$0xff]  }
  0xc6   :  { %1291 = vmatpush1.bf16.msra.mxu1 %v1936_v3  ;;  %1249 = vmatprep.subr.bf16.mxu0 %v1941_v4  ;;  %v1972_v3 = vld [vmem:[#allocation9 + $0x18] sm:$0xff]   ;;  %v1973_v4 = vld [vmem:[#allocation9 + $0x20] sm:$0xff]  }
  0xc7   :  { %1292 = vmatprep.subr.bf16.mxu1 %v1944_v5  ;;  %v1974_v5 = vld [vmem:[#allocation9 + $0x28] sm:$0xff]  }
  0xc9   :  { %1250 = vmatpush1.bf16.msra.mxu0 %v1939_v6  ;;  %v1975_v6 = vld [vmem:[#allocation9 + $0x30] sm:$0xff]  }
  0xca   :  { %1293 = vmatpush1.bf16.msra.mxu1 %v1942_v7  ;;  %1251 = vmatprep.subr.bf16.mxu0 %v1947_v8  ;;  %v1976_v7 = vld [vmem:[#allocation9 + $0x38] sm:$0xff]   ;;  %v887_v8 = vlaneseq }
  0xcb   :  { %1294 = vmatprep.subr.bf16.mxu1 %v1950_v9 }
  0xcc   :  { %v888_v9 = vshrl.u32 %v887_v8, 7 }
  0xcd   :  { %1252 = vmatpush1.bf16.msra.mxu0 %v1945_v10 }
  0xce   :  { %1295 = vmatpush1.bf16.msra.mxu1 %v1948_v11  ;;  %1253 = vmatprep.subr.bf16.mxu0 %v1953_v12  ;;  %v889_v10 = vsub.s32 0, %v888_v9  ;;  %v106_v11 = vld [vmem:[%s2308_s4 + $0x1] sm:$0xf]  ;;  %v893_v12 = vsub.s32 1, %v888_v9 }
  0xcf   :  { %1296 = vmatprep.subr.bf16.mxu1 %v1956_v13 }
  0xd0   :  { %v890_v13 = vrot.slane %v106_v11, %v889_v10 }
  0xd1   :  { %1254 = vmatpush1.bf16.msra.mxu0 %v1951_v14  ;;  %v897_v14 = vsub.s32 2, %v888_v9 }
  0xd2   :  { %1297 = vmatpush1.bf16.msra.mxu1 %v1954_v15  ;;  %1255 = vmatprep.subr.bf16.mxu0 %v1959_v16  ;;  %v894_v15 = vrot.slane %v106_v11, %v893_v12  ;;  %v1668_v12 = vld [vmem:[%s2308_s4 + $0x5] ss:$0 sm:$0xff]  ;;  %s2161_s4 = smov [#allocation12]  }
  0xd3   :  { %1298 = vmatprep.subr.bf16.mxu1 %v1962_v17  ;;  %s1525_s15 = sshll.u32 %s2161_s4, 4  ;;  %s1526_s15 = int_to_ptr.vmem [resolvable:$true] %s1525_s15 }
  0xd4   :  { %s2119_s16 = scalar_lea.vmem %s1526_s15, 768  ;;  %p2124_p13 = scmp.lt.s32.totalorder %s1526_s15, %s1526_s15 }
  0xd5   :  { %1256 = vmatpush1.bf16.msra.mxu0 %v1957_v18  ;;  %p2120_p12 = scmp.ne.s32.totalorder %s1526_s15, %s2119_s16  ;;  %p2125_p0 = scmp.lt.s32.totalorder %s2119_s16, %s2119_s16 }
  0xd6   :  { %1299 = vmatpush1.bf16.msra.mxu1 %v1960_v19  ;;  %1257 = vmatprep.subr.bf16.mxu0 %v1965_v20  ;;  %v898_v19 = vrot.slane %v106_v11, %v897_v14 }
  0xd7   :  { %1300 = vmatprep.subr.bf16.mxu1 %v1968_v21  ;;  %v901_v21 = vsub.s32 3, %v888_v9  ;;  %p2126_p1 = por %p2125_p0, %p2124_p13 }
  0xd9   :  { %1258 = vmatpush1.bf16.msra.mxu0 %v1963_v22  ;;  %p2127_p2 = pnand %p2126_p1, %p2120_p12 }
  0xda   :  { %1301 = vmatpush1.bf16.msra.mxu1 %v1966_v23  ;;  %1774 = vmatprep.subr.bf16.mxu0 %v2159_v0 }
 0x14f   :  { %v1693_v27 = vpop.f32.mrb[0].mxu0 }
 0x150   :  { %v1715_v28 = vpop.f32.mrb[0].mxu1  ;;  %v1694_v30 = vpop.f32.mrb[1].mxu0 }
 0x151   :  { %v1695_v31 = vadd.f32 %v1694_v30, %v1693_v27  ;;  %v1716_v32 = vpop.f32.mrb[1].mxu1  ;;  %v1696_v33 = vpop.f32.mrb[2].mxu0 }
 0x152   :  { %v1717_v34 = vadd.f32 %v1716_v32, %v1715_v28  ;;  %v1718_v35 = vpop.f32.mrb[2].mxu1  ;;  %v1697_v36 = vpop.f32.mrb[3].mxu0 }
 0x153   :  { %v685_v37 = vadd.f32 %v1695_v31, %v1539_v29  ;;  %v1698_v38 = vadd.f32 %v1697_v36, %v1696_v33  ;;  %v1719_v39 = vpop.f32.mrb[3].mxu1  ;;  %v902_v33 = vrot.slane %v106_v11, %v901_v21  ;;  %v2272_v11 = vand.u32 127, %v887_v8 }
 0x154   :  { %v1720_v40 = vadd.f32 %v1719_v39, %v1718_v35 }
 0x155   :  { %v726_v41 = vadd.f32 %v1717_v34, %v685_v37  ;;  %v688_v42 = vadd.f32 %v1698_v38, %v1539_v29  ;;  %vm1463_vm1 = vcmp.lt.s32.totalorder %v2272_v11, 8  ;;  %vm1504_vm2 = vcmp.eq.s32.totalorder %v2272_v11, 8 }
 0x156   :  { %vm1507_vm3 = vcmp.eq.s32.totalorder %v2272_v11, 9 }
 0x157   :  { %v729_v43 = vadd.f32 %v1720_v40, %v688_v42 }
 0x16f   :  { %v1737_v44 = vpop.f32.mrb[4].mxu0 }
 0x170   :  { %v1759_v45 = vpop.f32.mrb[4].mxu1  ;;  %v1738_v46 = vpop.f32.mrb[5].mxu0 }
 0x171   :  { %v1739_v47 = vadd.f32 %v1738_v46, %v1737_v44  ;;  %v1760_v48 = vpop.f32.mrb[5].mxu1  ;;  %v1740_v49 = vpop.f32.mrb[6].mxu0 }
 0x172   :  { %v1761_v50 = vadd.f32 %v1760_v48, %v1759_v45  ;;  %v1762_v51 = vpop.f32.mrb[6].mxu1  ;;  %v1741_v52 = vpop.f32.mrb[7].mxu0 }
 0x173   :  { %v767_v53 = vadd.f32 %v1739_v47, %v726_v41  ;;  %v1742_v54 = vadd.f32 %v1741_v52, %v1740_v49  ;;  %v1763_v55 = vpop.f32.mrb[7].mxu1  ;;  %v98_v47 = vld [vmem:[#allocation11 + $0x8] sm:$0xff] }
 0x174   :  { %v1764_v56 = vadd.f32 %v1763_v55, %v1762_v51 }
 0x175   :  { %v808_v57 = vadd.f32 %v1761_v50, %v767_v53  ;;  %v770_v58 = vadd.f32 %v1742_v54, %v729_v43 }
 0x177   :  { %v811_v59 = vadd.f32 %v1764_v56, %v770_v58  ;;  %v814_v60 = vmax.f32 %v808_v57, 0.0  ;;  %v100_v57 = vld [vmem:[#allocation11 + $0x18] sm:$0xff] }
 0x179   :  { %v815_v61 = vmax.f32 %v811_v59, 0.0 }
 0x17b   :  { %v820_v62 = vpack.c.bf16 %v815_v61, %v814_v60 }
 0x17d   :  { %1260 = vmatmul.mubr.bf16.vlgmr.msra.gmra.mrb[8].mxu0 %v820_v62  ;;  %1303 = vmatmul.mubr.bf16.vlgmr.msra.gmra.mrb[8].mxu1 %v820_v62 }
 0x17e   :  { %1775 = vmatpush3.bf16.msra.mxu0 %v1969_v63  ;;  %1790 = vmatprep.mubr.msk.bf16.mxu0 %vm2160_vm0, %v2159_v0 }
 0x17f   :  { %1776 = vmatprep.subr.bf16.mxu0 %v2159_v0 }
 0x182   :  { %1777 = vmatpush3.bf16.msra.mxu0 %v1970_v1 }
 0x183   :  { %1778 = vmatprep.subr.bf16.mxu0 %v2159_v0 }
 0x186   :  { %1779 = vmatpush3.bf16.msra.mxu0 %v1971_v2 }
 0x187   :  { %1780 = vmatprep.subr.bf16.mxu0 %v2159_v0 }
 0x18a   :  { %1781 = vmatpush3.bf16.msra.mxu0 %v1972_v3 }
 0x18b   :  { %1782 = vmatprep.subr.bf16.mxu0 %v2159_v0 }
 0x18e   :  { %1783 = vmatpush3.bf16.msra.mxu0 %v1973_v4 }
 0x18f   :  { %1784 = vmatprep.subr.bf16.mxu0 %v2159_v0 }
 0x192   :  { %1785 = vmatpush3.bf16.msra.mxu0 %v1974_v5 }
 0x193   :  { %1786 = vmatprep.subr.bf16.mxu0 %v2159_v0 }
 0x196   :  { %1787 = vmatpush3.bf16.msra.mxu0 %v1975_v6 }
 0x197   :  { %1788 = vmatprep.subr.bf16.mxu0 %v2159_v0 }
 0x19a   :  { %1789 = vmatpush3.bf16.msra.mxu0 %v1976_v7 }
 0x250   :  { %v1261_v16 = vpop.f32.mrb[8].mxu0  ;;  %v1304_v17 = vpop.f32.mrb[8].mxu1 }
 0x251   :  { %v1262_v18 = vadd.f32 %v1261_v16, %v890_v13  ;;  %v1263_v20 = vpop.f32.mrb[9].mxu0  ;;  %v1306_v22 = vpop.f32.mrb[9].mxu1  ;;  %v1305_v32 = vadd.f32 %v1304_v17, %v898_v19 }
 0x252   :  { %v1264_v23 = vadd.f32 %v1263_v20, %v894_v15  ;;  %v1265_v24 = vpop.f32.mrb[10].mxu0  ;;  %v1308_v25 = vpop.f32.mrb[10].mxu1  ;;  %v1307_v37 = vadd.f32 %v1306_v22, %v902_v33 }
 0x253   :  { %v1313_v26 = vmul.f32 0.5, %v1262_v18  ;;  %v1266_v27 = vadd.f32 %v1265_v24, %v890_v13  ;;  %v1267_v28 = vpop.f32.mrb[11].mxu0  ;;  %v1310_v29 = vpop.f32.mrb[11].mxu1  ;;  %v1309_v36 = vadd.f32 %v1308_v25, %v898_v19 }
 0x254   :  { %v1321_v30 = vmul.f32 0.5, %v1264_v23  ;;  %v1268_v31 = vadd.f32 %v1267_v28, %v894_v15  ;;  %v1331_v38 = vmul.f32 0.5, %v1307_v37  ;;  %v1311_v39 = vadd.f32 %v1310_v29, %v902_v33 }
 0x255   :  { %1977 = vtanh.f32 %v1313_v26  ;;  %v1314_v34 = vmul.f32 0.5, %v1266_v27 }
 0x256   :  { %1979 = vtanh.f32 %v1321_v30  ;;  %v1322_v35 = vmul.f32 0.5, %v1268_v31  ;;  %v1332_v44 = vmul.f32 0.5, %v1311_v39 }
 0x257   :  { %1981 = vtanh.f32 %v1314_v34 }
 0x258   :  { %1983 = vtanh.f32 %v1305_v32 }
 0x259   :  { %1985 = vtanh.f32 %v1322_v35 }
 0x25a   :  { %1987 = vtanh.f32 %v1309_v36 }
 0x25b   :  { %1989 = vtanh.f32 %v1331_v38 }
 0x25c   :  { %1991 = vtanh.f32 %v1332_v44 }
 0x25f   :  { %v1978_v40 = vpop.eup %1977 }
 0x260   :  { %v1980_v41 = vpop.eup %1979  ;;  %v1317_v42 = vadd.f32 1.0, %v1978_v40 }
 0x261   :  { %v1325_v43 = vadd.f32 1.0, %v1980_v41  ;;  %v1982_v45 = vpop.eup %1981 }
 0x262   :  { %v1319_v46 = vmul.f32 0.5, %v1317_v42  ;;  %v1984_v48 = vpop.eup %1983  ;;  %v1318_v50 = vadd.f32 1.0, %v1982_v45 }
 0x263   :  { %v1327_v49 = vmul.f32 0.5, %v1325_v43  ;;  %v1986_v51 = vpop.eup %1985 }
 0x264   :  { %v1341_v52 = vmul.f32 %v1984_v48, %v1319_v46  ;;  %v1320_v54 = vmul.f32 0.5, %v1318_v50  ;;  %v1326_v55 = vadd.f32 1.0, %v1986_v51  ;;  %v1988_v56 = vpop.eup %1987 }
 0x265   :  { %v1339_v53 = vmul.f32 %v1327_v49, %v98_v47  ;;  %v1990_v62 = vpop.eup %1989 }
 0x266   :  { %v1328_v59 = vmul.f32 0.5, %v1326_v55  ;;  %v1342_v60 = vmul.f32 %v1988_v56, %v1320_v54  ;;  %v1335_v0 = vadd.f32 1.0, %v1990_v62  ;;  %v1992_v1 = vpop.eup %1991 }
 0x267   :  { %v1343_v58 = vadd.f32 %v1341_v52, %v1339_v53  ;;  %v1336_v3 = vadd.f32 1.0, %v1992_v1 }
 0x268   :  { %v1340_v61 = vmul.f32 %v1328_v59, %v100_v57  ;;  %v1337_v2 = vmul.f32 0.5, %v1335_v0 }
 0x269   :  { %1993 = vtanh.f32 %v1343_v58  ;;  %1514 = vst [vmem:[#allocation12 + $0x10] sm:$0xff] %v1343_v58  ;;  %v1338_v6 = vmul.f32 0.5, %v1336_v3 }
 0x26a   :  { %v1344_v63 = vadd.f32 %v1342_v60, %v1340_v61 }
 0x26c   :  { %1995 = vtanh.f32 %v1344_v63  ;;  %1515 = vst [vmem:[#allocation12 + $0x28] sm:$0xff] %v1344_v63 }
 0x273   :  { %v1994_v4 = vpop.eup %1993 }
 0x274   :  { %v1347_v5 = vmul.f32 %v1994_v4, %v1337_v2 }
 0x276   :  { %1512 = vst [vmem:[#allocation12 + $0x8] sm:$0xff] %v1347_v5  ;;  %v1996_v7 = vpop.eup %1995 }
 0x277   :  { %v1348_v9 = vmul.f32 %v1996_v7, %v1338_v6 }
 0x279   :  { %1513 = vst [vmem:[#allocation12 + $0x20] sm:$0xff] %v1348_v9  ;;  %v1349_v10 = vpack.c.bf16 %v1348_v9, %v1347_v5 }
 0x27b   :  { %1791 = vmatmul.mubr.bf16.vlgmr.msra.gmra.mrb[12].mxu0 %v1349_v10 }
 0x34e   :  { %v1454_v13 = vpop.f32.mrb[12].mxu0 }
 0x34f   :  { %v1455_v14 = vadd.f32 %v1668_v12, %v1454_v13  ;;  %v1792_v15 = vpop.f32.mrb[13].mxu0 }
 0x350   :  { %v1457_v16 = vpop.f32.mrb[14].mxu0 }
 0x351   :  { %v1458_v17 = vadd.f32 %v1668_v12, %v1457_v16  ;;  %v1793_v18 = vpop.f32.mrb[15].mxu0  ;;  %v1464_v19 = vsel %vm1463_vm1, %v1455_v14, -1e+30 }
 0x352   :  { %1466 = vmax.xlane.f32.xlu0 %v1464_v19 }
 0x353   :  { %v1465_v8 = vsel %vm1463_vm1, %v1458_v17, -1e+30 }
 0x356   :  { %1468 = vmax.xlane.f32.xlu0 %v1465_v8 }
 0x3df   :  { %v1467_v20 = vpop.xlane.xlu0 %1466 }
 0x3e0   :  { %v1470_v21 = vsub.f32 %v1464_v19, %v1467_v20 }
 0x3e2   :  { %v1472_v22 = vmul.f32 1.442695, %v1470_v21 }
 0x3e3   :  { %v1469_v23 = vpop.xlane.xlu0 %1468 }
 0x3e4   :  { %1997 = vpow2.f32 %v1472_v22  ;;  %v1471_v24 = vsub.f32 %v1465_v8, %v1469_v23 }
 0x3e6   :  { %v1474_v25 = vmul.f32 1.442695, %v1471_v24 }
 0x3e8   :  { %1999 = vpow2.f32 %v1474_v25 }
 0x3ee   :  { %v1998_v26 = vpop.eup %1997 }
 0x3ef   :  { %1476 = vadd.xlane.f32.xlu1 %v1998_v26 }
 0x3f2   :  { %v2000_v27 = vpop.eup %1999 }
 0x3f3   :  { %1478 = vadd.xlane.f32.xlu1 %v2000_v27 }
 0x47c   :  { %v1477_v28 = vpop.xlane.xlu1 %1476 }
 0x47d   :  { %2001 = vlog2.f32 %v1477_v28 }
 0x47e   :  { %2003 = vrcp.f32 %v1477_v28 }
 0x480   :  { %v1479_v29 = vpop.xlane.xlu1 %1478 }
 0x481   :  { %2005 = vlog2.f32 %v1479_v29 }
 0x482   :  { %2007 = vrcp.f32 %v1479_v29 }
 0x487   :  { %v2002_v30 = vpop.eup %2001 }
 0x488   :  { %v1481_v31 = vmul.f32 0.6931472, %v2002_v30  ;;  %v2004_v32 = vpop.eup %2003 }
 0x489   :  { %v1490_v37 = vmul.f32 %v2004_v32, %v1998_v26 }
 0x48a   :  { %v1484_v33 = vadd.f32 %v1481_v31, %v1467_v20 }
 0x48b   :  { %v2006_v34 = vpop.eup %2005 }
 0x48c   :  { %v1483_v35 = vmul.f32 0.6931472, %v2006_v34  ;;  %v1486_v36 = vsub.f32 %v1464_v19, %v1484_v33  ;;  %v2008_v38 = vpop.eup %2007 }
 0x48d   :  { %v1491_v43 = vmul.f32 %v2008_v38, %v2000_v27 }
 0x48e   :  { %v1492_v39 = vmul.f32 %v1490_v37, %v1486_v36  ;;  %v1485_v40 = vadd.f32 %v1483_v35, %v1469_v23  ;;  %v1502_v46 = vsel %vm1463_vm1, %v1486_v36, 0.0 }
 0x48f   :  { %v1505_v49 = vsel %vm1504_vm2, %v1455_v14, %v1502_v46 }
 0x490   :  { %v1494_v41 = vsel %vm1463_vm1, %v1492_v39, 0.0  ;;  %v1487_v42 = vsub.f32 %v1465_v8, %v1485_v40 }
 0x491   :  { %1496 = vadd.xlane.f32.xlu0 %v1494_v41 }
 0x492   :  { %v1493_v44 = vmul.f32 %v1491_v43, %v1487_v42  ;;  %v1503_v50 = vsel %vm1463_vm1, %v1487_v42, 0.0 }
 0x493   :  { %v1506_v54 = vsel %vm1504_vm2, %v1458_v17, %v1503_v50 }
 0x494   :  { %v1495_v45 = vsel %vm1463_vm1, %v1493_v44, 0.0 }
 0x495   :  { %1498 = vadd.xlane.f32.xlu1 %v1495_v45 }
 0x51e   :  { %v1497_v47 = vpop.xlane.xlu0 %1496 }
 0x51f   :  { %v1500_v48 = vsub.f32 0.0, %v1497_v47 }
 0x521   :  { %v1508_v51 = vsel %vm1507_vm3, %v1500_v48, %v1505_v49 }
 0x522   :  { %1510 = vst [vmem:[#allocation12] sm:$0xff] %v1508_v51  ;;  %v1499_v52 = vpop.xlane.xlu1 %1498 }
 0x523   :  { %v1501_v53 = vsub.f32 0.0, %v1499_v52 }
 0x525   :  { %v1509_v55 = vsel %vm1507_vm3, %v1501_v53, %v1506_v54 }
 0x526   :  { %1511 = vst [vmem:[#allocation12 + $0x18] sm:$0xff] %v1509_v55 }
 0x527   :  { %2130 = shalt.err (!%p2127_p2)
}
 0x528   :  { %s2131_s19 = scalar_lea.hbm %s2310_s6, 768 }
 0x529   :  { %p2132_p3 = scmp.ne.s32.totalorder %s2310_s6, %s2131_s19  ;;  %p2135_p4 = scmp.lt.u32.totalorder %s2131_s19, %s2310_s6 }
 0x52b   :  { %p2137_p5 = pnand %p2135_p4, %p2132_p3 }
 0x52d   :  { %2140 = shalt.err (!%p2137_p5)
}
 0x52e   :  { %s2162_s14 = smov 384   ;;  %s2163_s1 = smov 24  }
 0x52f   :  { %1531 = dma.vmem_to_hbm [thread:$0]  %s1526_s15, 768, %s2310_s6, [#allocation5], %s2162_s14, %s2162_s14, %s2163_s1  }
 0x530   :  { %2147 = dma.done.wait [#allocation5], 768  }
 0x531   :  { %2148 = vsyncadd [#allocation5], 4294966528 }
 0x532   :  { %1535 = vsyncpa [#allocation4], 1 }
 0x533   :  { %1536 = vsyncpa [#allocation7], 1 }
 0x534   :  { %1537 = vsyncpa [#allocation10], 1 }
 0x535   :  { %1538 = vsyncpa [#allocation5], 1 }

</bundles_post_ra>
